<compile_context>
chip_gen: v5e
topology: v5e:2x2
jax: 0.10.0
libtpu: 0.0.40
codegen_flags: <defaults>
</compile_context>

<pallas_src>
import functools

import jax
import jax.numpy as jnp
from jax import lax
from jax.experimental import pallas as pl
from jax.experimental.pallas import tpu as pltpu


# ---------------------------------------------------------------------------
# Fused kernel: full MLP on the (T*N, F) activation slab.  Weights/biases are
# carved out of a single packed VMEM slab with static (zero-cost) slices.
# layer_meta[li] = (w_off, w_rows, w_cols, b_off, b_rows, b_cols); the last
# layer's weight is stored pre-transposed (out_dim, H_last) and its bias as
# (out_dim, 1) so the output store is lane-dense (out_dim, T*N).
# ---------------------------------------------------------------------------
def _beta_kernel(layer_meta, x_ref, slab_ref, out_ref):
    f32 = jnp.float32
    x = x_ref[...]                                           # (T*N, F)

    n = len(layer_meta)
    for li in range(n - 1):                                  # Linear + ReLU layers
        w_off, w_rows, w_cols, b_off, b_rows, b_cols = layer_meta[li]
        w = slab_ref[w_off:w_off + w_rows, 0:w_cols]         # (in, H)
        b = slab_ref[b_off:b_off + b_rows, 0:b_cols]         # (1, H)
        x = jnp.maximum(jnp.dot(x, w, preferred_element_type=f32) + b, 0.0)
        # Dropout(0.1): identity at eval time.

    # Final Linear, computed transposed -> lane-dense (out_dim, T*N) store.
    w_off, w_rows, w_cols, b_off, b_rows, b_cols = layer_meta[-1]
    w_t = slab_ref[w_off:w_off + w_rows, 0:w_cols]           # (out_dim, H_last)
    b_t = slab_ref[b_off:b_off + b_rows, 0:b_cols]           # (out_dim, 1)
    out_t = lax.dot_general(w_t, x, (((1,), (1,)), ((), ())),
                            preferred_element_type=f32)      # (out_dim, T*N)
    out_ref[...] = out_t + b_t


# ---------------------------------------------------------------------------
# Pack all Linear weights/biases into one f32 slab (single input DMA).
# Each block starts on an 8-aligned sublane row so in-kernel slices are clean.
# ---------------------------------------------------------------------------
def _align8(x):
    return (x + 7) // 8 * 8


def pack_params(params):
    fc_w, fc_b = params["fc_w"], params["fc_b"]
    n = len(fc_w)

    blocks = []
    for li in range(n - 1):
        blocks.append(jnp.asarray(fc_w[li], jnp.float32))                 # (in, H)
        blocks.append(jnp.asarray(fc_b[li], jnp.float32).reshape(1, -1))  # (1, H)
    blocks.append(jnp.asarray(fc_w[-1], jnp.float32).T)                   # (out, H_last)
    blocks.append(jnp.asarray(fc_b[-1], jnp.float32).reshape(-1, 1))      # (out, 1)

    width = max(b.shape[1] for b in blocks)
    offs, r = [], 0
    for b in blocks:
        offs.append(r)
        r = _align8(r + b.shape[0])
    slab = jnp.zeros((_align8(r), width), jnp.float32)
    for off, b in zip(offs, blocks):
        slab = slab.at[off:off + b.shape[0], 0:b.shape[1]].set(b)

    layer_meta = []
    for li in range(n):
        w_blk, b_blk = blocks[2 * li], blocks[2 * li + 1]
        layer_meta.append((offs[2 * li], w_blk.shape[0], w_blk.shape[1],
                           offs[2 * li + 1], b_blk.shape[0], b_blk.shape[1]))
    return slab, tuple(layer_meta)


# ---------------------------------------------------------------------------
# Jitted forward over the full (T, N) grid: broadcast+concat glue, fused MLP
# kernel, and fixed-size in-jit mask compaction (no host sync, no eager ops).
# Returns (beta_padded, count): the first `count` rows (row-major True order,
# identical to PyTorch boolean indexing) are valid; the rest are padding.
# ---------------------------------------------------------------------------
@functools.partial(jax.jit, static_argnames=("layer_meta",))
def beta_model_forward(slab, I_mac, I_ind, mask, *, layer_meta):
    T, F_mac = I_mac.shape
    _, N, F_ind = I_ind.shape
    rows = T * N
    out_dim = layer_meta[-1][1]

    # I_mac.repeat(1, N, 1) + torch.cat -> one (rows, F_mac+F_ind) slab (tiny).
    x_in = jnp.concatenate(
        [jnp.broadcast_to(I_mac[:, None, :], (T, N, F_mac)).reshape(rows, F_mac),
         I_ind.reshape(rows, F_ind)], axis=1)

    vmem = pl.BlockSpec(memory_space=pltpu.MemorySpace.VMEM)
    out_t = pl.pallas_call(
        functools.partial(_beta_kernel, layer_meta),
        out_shape=jax.ShapeDtypeStruct((out_dim, rows), jnp.float32),
        in_specs=[vmem, vmem],
        out_specs=vmem,
    )(x_in, slab)                                            # (out_dim, rows)

    y = out_t.T                                              # (rows, out_dim)

    # Fixed-size, order-preserving compaction (fc is row-wise, so dense-then-
    # mask == PyTorch's mask-then-fc).  Dynamic row count stays on-device.
    flat_mask = mask.reshape(-1)
    idx = jnp.nonzero(flat_mask, size=rows, fill_value=0)[0]
    beta_padded = jnp.take(y, idx, axis=0)                   # (rows, out_dim)
    count = jnp.sum(flat_mask.astype(jnp.int32))
    return beta_padded, count


# ---------------------------------------------------------------------------
# Deterministic PyTorch-style parameter init (U(-1/sqrt(fan_in), +1/sqrt(fan_in))).
# Weights stored as (in, out) for row-major x @ W.
# ---------------------------------------------------------------------------
def init_params(key, mac_feature_dim, ind_feature_dim, fcs):
    dims = [mac_feature_dim + ind_feature_dim] + list(fcs)
    n = len(fcs)
    keys = jax.random.split(key, 2 * n)
    fc_w, fc_b = [], []
    for i in range(n):
        k = 1.0 / (dims[i] ** 0.5)
        fc_w.append(jax.random.uniform(keys[2 * i], (dims[i], dims[i + 1]),
                                       jnp.float32, -k, k))
        fc_b.append(jax.random.uniform(keys[2 * i + 1], (dims[i + 1],),
                                       jnp.float32, -k, k))
    return {"fc_w": fc_w, "fc_b": fc_b}


# ---------------------------------------------------------------------------
# Pure-JAX reference mirroring the PyTorch forward op-for-op (eval mode).
# ---------------------------------------------------------------------------
def beta_model_reference(params, I_mac, I_ind, mask):
    T, F_mac = I_mac.shape
    N = mask.shape[1]
    I_mac_tile = jnp.broadcast_to(I_mac[:, None, :], (T, N, F_mac))
    I_mac_masked = I_mac_tile[mask]                          # (M, F_mac)
    I_ind_masked = I_ind[mask]                               # (M, F_ind)
    x = jnp.concatenate([I_mac_masked, I_ind_masked], axis=1)
    n = len(params["fc_w"])
    for li, (w, b) in enumerate(zip(params["fc_w"], params["fc_b"])):
        x = x @ w + b
        if li < n - 1:
            x = jnp.maximum(x, 0.0)                          # ReLU (Dropout = identity)
    return x


if __name__ == "__main__":
    mac_feature_dim, ind_feature_dim = 8, 16
    fcs = [64, 32, 1]
    T, N = 8, 8

    key = jax.random.PRNGKey(0)
    k_p, k_mac, k_ind, k_mask = jax.random.split(key, 4)
    params = init_params(k_p, mac_feature_dim, ind_feature_dim, fcs)
    I_mac = jax.random.normal(k_mac, (T, mac_feature_dim), jnp.float32)
    I_ind = jax.random.normal(k_ind, (T, N, ind_feature_dim), jnp.float32)
    mask = jax.random.bernoulli(k_mask, 0.7, (T, N))
    mask = mask.at[0, 0].set(True)                           # guarantee >= 1 row

    slab, layer_meta = pack_params(params)                   # one-time param prep

    beta_padded, count = beta_model_forward(slab, I_mac, I_ind, mask,
                                            layer_meta=layer_meta)
    beta_padded = jax.block_until_ready(beta_padded)

    # Demo-only host slice to the PyTorch output shape (M, out_dim); deployed
    # consumers can keep the padded (T*N, out_dim) + count form and stay async.
    M = int(count)
    out = beta_padded[:M]

    ref = beta_model_reference(params, I_mac, I_ind, mask)
    assert out.shape == (M, fcs[-1]), out.shape
    max_err = float(jnp.max(jnp.abs(out - ref)))
    assert max_err < 1e-4, f"mismatch vs reference: {max_err}"
    print("KERNEL_OK")
</pallas_src>

<mosaic_0001>
module attributes {stable_mosaic.version = 11 : i64} {
  func.func @_beta_kernel(%arg0: memref<64x24xf32, #tpu.memory_space<vmem>>, %arg1: memref<120x64xf32, #tpu.memory_space<vmem>>, %arg2: memref<1x64xf32, #tpu.memory_space<vmem>>) attributes {dimension_semantics = [], scalar_prefetch = 0 : i64, scratch_operands = 0 : i64, tpu.core_type = #tpu.core_type<tc>} {
    %c0 = arith.constant 0 : index
    %c0_0 = arith.constant 0 : index
    %0 = vector.load %arg0[%c0, %c0_0] : memref<64x24xf32, #tpu.memory_space<vmem>>, vector<64x24xf32>
    %c0_1 = arith.constant 0 : index
    %c0_2 = arith.constant 0 : index
    %1 = vector.load %arg1[%c0_1, %c0_2] : memref<120x64xf32, #tpu.memory_space<vmem>>, vector<24x64xf32>
    %c24 = arith.constant 24 : index
    %c0_3 = arith.constant 0 : index
    %2 = vector.load %arg1[%c24, %c0_3] : memref<120x64xf32, #tpu.memory_space<vmem>>, vector<1x64xf32>
    %cst = arith.constant dense<0.000000e+00> : vector<64x64xf32>
    %3 = tpu.matmul %0, %1, %cst {dimension_numbers = #tpu.dot_dimension_numbers<[1], [0], [0], [1], [0, 0, 1, 1], [], []>} : vector<64x24xf32>, vector<24x64xf32>, vector<64x64xf32> -> vector<64x64xf32>
    %4 = vector.broadcast %2 : vector<1x64xf32> to vector<64x64xf32>
    %5 = arith.addf %3, %4 : vector<64x64xf32>
    %cst_4 = arith.constant 0.000000e+00 : f32
    %6 = vector.broadcast %cst_4 : f32 to vector<64x64xf32>
    %7 = arith.maximumf %5, %6 : vector<64x64xf32>
    %c32 = arith.constant 32 : index
    %c0_5 = arith.constant 0 : index
    %8 = vector.load %arg1[%c32, %c0_5] : memref<120x64xf32, #tpu.memory_space<vmem>>, vector<64x32xf32>
    %c96 = arith.constant 96 : index
    %c0_6 = arith.constant 0 : index
    %9 = vector.load %arg1[%c96, %c0_6] : memref<120x64xf32, #tpu.memory_space<vmem>>, vector<1x32xf32>
    %cst_7 = arith.constant dense<0.000000e+00> : vector<64x32xf32>
    %10 = tpu.matmul %7, %8, %cst_7 {dimension_numbers = #tpu.dot_dimension_numbers<[1], [0], [0], [1], [0, 0, 1, 1], [], []>} : vector<64x64xf32>, vector<64x32xf32>, vector<64x32xf32> -> vector<64x32xf32>
    %11 = vector.broadcast %9 : vector<1x32xf32> to vector<64x32xf32>
    %12 = arith.addf %10, %11 : vector<64x32xf32>
    %cst_8 = arith.constant 0.000000e+00 : f32
    %13 = vector.broadcast %cst_8 : f32 to vector<64x32xf32>
    %14 = arith.maximumf %12, %13 : vector<64x32xf32>
    %c104 = arith.constant 104 : index
    %c0_9 = arith.constant 0 : index
    %15 = vector.load %arg1[%c104, %c0_9] : memref<120x64xf32, #tpu.memory_space<vmem>>, vector<1x32xf32>
    %c112 = arith.constant 112 : index
    %c0_10 = arith.constant 0 : index
    %16 = vector.load %arg1[%c112, %c0_10] : memref<120x64xf32, #tpu.memory_space<vmem>>, vector<1x1xf32>
    %cst_11 = arith.constant dense<0.000000e+00> : vector<1x64xf32>
    %17 = tpu.matmul %15, %14, %cst_11 {dimension_numbers = #tpu.dot_dimension_numbers<[1], [1], [0], [0], [0, 0, 1, 0], [], []>} : vector<1x32xf32>, vector<64x32xf32>, vector<1x64xf32> -> vector<1x64xf32>
    %18 = vector.broadcast %16 : vector<1x1xf32> to vector<1x64xf32>
    %19 = arith.addf %17, %18 : vector<1x64xf32>
    %c0_12 = arith.constant 0 : index
    %c0_13 = arith.constant 0 : index
    %20 = vector.load %arg2[%c0_12, %c0_13] : memref<1x64xf32, #tpu.memory_space<vmem>>, vector<1x64xf32>
    tpu.vector_store %arg2[%c0_12, %c0_13], %19 {strides = array<i32>} : memref<1x64xf32, #tpu.memory_space<vmem>>, vector<1x64xf32>,
    return
  }
}

</mosaic_0001>

<bundles_post_ra>
// kernel: beta_model_forward.1
= control target key start
LH: loop header
LB: loop body
LE: loop exit
PB: predicated region body
PF: predicated region fallthrough
CT: control target
= control target key end

     0   :  { %vm24_vm0 = vcmask 195584   ;;  %vm108_vm1 = vcmask 523264   ;;  %vm189_vm2 = vcmask 261120   ;;  %v280_v56 = vmov 0   ;;  %s393_s1 = inlined_call_operand.vmem [shape: f32[120,64], index: 1, kind: input, shape index: {}]   ;;  %s394_s0 = inlined_call_operand.vmem [shape: f32[64,24], index: 0, kind: input, shape index: {}]   ;;  %s395_s2 = inlined_call_operand.vmem [shape: f32[1,64], index: 2, kind: output, shape index: {}]  }
   0x1   :  { %v21_v0 = vld [vmem:[%s393_s1 + $0x10] sm:$0xff]  ;;  %v20_v1 = vld [vmem:[%s393_s1 + $0x8] sm:$0xff]  ;;  %v19_v2 = vld [vmem:[%s393_s1] sm:$0xff]  ;;  %277 = vset.pattern.permute.xlu0 %v280_v56  ;;  %vm237_vm3 = vcmask 516096  }
   0x2   :  { %62 = vmatpush.msra.mxu0 %v21_v0  ;;  %v11_v3 = vld [vmem:[%s394_s0] sm:$0xff]  ;;  %v12_v4 = vld [vmem:[%s394_s0 + $0x8] sm:$0xff]  ;;  %v13_v5 = vld [vmem:[%s394_s0 + $0x10] sm:$0xff] }
   0x3   :  { %v14_v6 = vld [vmem:[%s394_s0 + $0x18] sm:$0xff]  ;;  %v104_v8 = vld [vmem:[%s393_s1 + $0x50] sm:$0xff]  ;;  %v103_v9 = vld [vmem:[%s393_s1 + $0x48] sm:$0xff] }
   0x4   :  { %63 = vmatpush.msra.mxu0 %v20_v1  ;;  %v105_v7 = vld [vmem:[%s393_s1 + $0x58] sm:$0xff]  ;;  %v102_v10 = vld [vmem:[%s393_s1 + $0x40] sm:$0xff]  ;;  %v16_v13 = vld [vmem:[%s394_s0 + $0x28] sm:$0xff] }
   0x5   :  { %141 = vmatpush.msra.mxu1 %v105_v7  ;;  %268 = vmatpush.msra.mxu3 %v105_v7  ;;  %v15_v11 = vld [vmem:[%s394_s0 + $0x20] sm:$0xff]  ;;  %v101_v12 = vld [vmem:[%s393_s1 + $0x38] sm:$0xff]  ;;  %v17_v14 = vld [vmem:[%s394_s0 + $0x30] sm:$0xff] }
   0x6   :  { %64 = vmatpush.msra.mxu0 %v19_v2  ;;  %v18_v15 = vld [vmem:[%s394_s0 + $0x38] sm:$0xff]  ;;  %v100_v16 = vld [vmem:[%s393_s1 + $0x30] sm:$0xff]  ;;  %v99_v17 = vld [vmem:[%s393_s1 + $0x28] sm:$0xff] }
   0x7   :  { %243 = vmatmul.msk.f32.vlgmr.msra.gmra.mxu0 %vm24_vm0, %v11_v3  ;;  %142 = vmatpush.msra.mxu1 %v104_v8  ;;  %v98_v18 = vld [vmem:[%s393_s1 + $0x20] sm:$0xff]  ;;  %v278_v19 = vld [vmem:[%s393_s1 + $0x18] ss:$0 sm:$0xff]  ;;  %v183_v55 = vld [vmem:[%s393_s1 + $0x70] sm:$0x1] }
   0x8   :  { %269 = vmatpush.msra.mxu3 %v104_v8  ;;  %v279_v50 = vld [vmem:[%s393_s1 + $0x60] ss:$0 sm:$0xff]  ;;  %186 = vperm.xlu0 %277, %v183_v55   ;;  %v182_v7 = vld [vmem:[%s393_s1 + $0x68] sm:$0x1] }
   0x9   :  { %143 = vmatpush.msra.mxu1 %v103_v9 }
   0xa   :  { %270 = vmatpush.msra.mxu3 %v103_v9 }
   0xb   :  { %144 = vmatpush.msra.mxu1 %v102_v10 }
   0xc   :  { %271 = vmatpush.msra.mxu3 %v102_v10 }
   0xd   :  { %145 = vmatpush.msra.mxu1 %v101_v12 }
   0xe   :  { %272 = vmatpush.msra.mxu3 %v101_v12 }
   0xf   :  { %244 = vmatmul.msk.f32.gmra.mxu0 %vm24_vm0, %v12_v4  ;;  %146 = vmatpush.msra.mxu1 %v100_v16 }
  0x10   :  { %273 = vmatpush.msra.mxu3 %v100_v16 }
  0x11   :  { %147 = vmatpush.msra.mxu1 %v99_v17 }
  0x12   :  { %274 = vmatpush.msra.mxu3 %v99_v17 }
  0x13   :  { %148 = vmatpush.msra.mxu1 %v98_v18 }
  0x14   :  { %275 = vmatpush.msra.mxu3 %v98_v18 }
  0x17   :  { %245 = vmatmul.msk.f32.gmra.mxu0 %vm24_vm0, %v13_v5 }
  0x1f   :  { %246 = vmatmul.msk.f32.gmra.mxu0 %vm24_vm0, %v14_v6 }
  0x27   :  { %247 = vmatmul.msk.f32.gmra.mxu0 %vm24_vm0, %v15_v11 }
  0x2f   :  { %248 = vmatmul.msk.f32.gmra.mxu0 %vm24_vm0, %v16_v13 }
  0x37   :  { %249 = vmatmul.msk.f32.gmra.mxu0 %vm24_vm0, %v17_v14 }
  0x3f   :  { %250 = vmatmul.msk.f32.gmra.mxu0 %vm24_vm0, %v18_v15 }
  0x7a   :  { %v187_v8 = vpop.permute.xlu0 %186 }
  0x84   :  { %v66_v20 = vpop.f32.mrf.mxu0 }
  0x85   :  { %v67_v21 = vadd.f32 %v278_v19, %v66_v20 }
  0x87   :  { %v90_v22 = vmax.f32 %v67_v21, 0.0 }
  0x89   :  { %251 = vmatmul.msk.f32.vlgmr.msra.gmra.mxu1 %vm108_vm1, %v90_v22 }
  0x8c   :  { %v69_v23 = vpop.f32.mrf.mxu0 }
  0x8d   :  { %v70_v24 = vadd.f32 %v278_v19, %v69_v23 }
  0x8f   :  { %v91_v25 = vmax.f32 %v70_v24, 0.0 }
  0x91   :  { %252 = vmatmul.msk.f32.gmra.mxu1 %vm108_vm1, %v91_v25 }
  0x94   :  { %v72_v26 = vpop.f32.mrf.mxu0 }
  0x95   :  { %v73_v27 = vadd.f32 %v278_v19, %v72_v26 }
  0x97   :  { %v92_v28 = vmax.f32 %v73_v27, 0.0 }
  0x99   :  { %253 = vmatmul.msk.f32.gmra.mxu1 %vm108_vm1, %v92_v28 }
  0x9c   :  { %v75_v29 = vpop.f32.mrf.mxu0 }
  0x9d   :  { %v76_v30 = vadd.f32 %v278_v19, %v75_v29 }
  0x9f   :  { %v93_v31 = vmax.f32 %v76_v30, 0.0 }
  0xa1   :  { %254 = vmatmul.msk.f32.gmra.mxu1 %vm108_vm1, %v93_v31 }
  0xa4   :  { %v78_v32 = vpop.f32.mrf.mxu0 }
  0xa5   :  { %v79_v33 = vadd.f32 %v278_v19, %v78_v32 }
  0xa7   :  { %v94_v34 = vmax.f32 %v79_v33, 0.0 }
  0xa9   :  { %255 = vmatmul.msk.f32.gmra.mxu1 %vm108_vm1, %v94_v34 }
  0xac   :  { %v81_v35 = vpop.f32.mrf.mxu0 }
  0xad   :  { %v82_v36 = vadd.f32 %v278_v19, %v81_v35 }
  0xaf   :  { %v95_v37 = vmax.f32 %v82_v36, 0.0 }
  0xb1   :  { %256 = vmatmul.msk.f32.vlgmr.msra.gmra.mxu3 %vm108_vm1, %v95_v37 }
  0xb4   :  { %v84_v38 = vpop.f32.mrf.mxu0 }
  0xb5   :  { %v85_v39 = vadd.f32 %v278_v19, %v84_v38 }
  0xb7   :  { %v96_v40 = vmax.f32 %v85_v39, 0.0 }
  0xb9   :  { %257 = vmatmul.msk.f32.gmra.mxu3 %vm108_vm1, %v96_v40 }
  0xbc   :  { %v87_v41 = vpop.f32.mrf.mxu0 }
  0xbd   :  { %v88_v42 = vadd.f32 %v278_v19, %v87_v41 }
  0xbf   :  { %v97_v43 = vmax.f32 %v88_v42, 0.0 }
  0xc1   :  { %258 = vmatmul.msk.f32.gmra.mxu3 %vm108_vm1, %v97_v43 }
 0x106   :  { %v150_v44 = vpop.f32.mrf.mxu1 }
 0x107   :  { %v151_v4 = vadd.f32 %v279_v50, %v150_v44 }
 0x109   :  { %v174_v6 = vmax.f32 %v151_v4, 0.0 }
 0x10e   :  { %v153_v45 = vpop.f32.mrf.mxu1 }
 0x10f   :  { %v154_v2 = vadd.f32 %v279_v50, %v153_v45 }
 0x111   :  { %v175_v5 = vmax.f32 %v154_v2, 0.0 }
 0x116   :  { %v156_v47 = vpop.f32.mrf.mxu1 }
 0x117   :  { %v157_v0 = vadd.f32 %v279_v50, %v156_v47 }
 0x119   :  { %v176_v3 = vmax.f32 %v157_v0, 0.0 }
 0x11e   :  { %v159_v49 = vpop.f32.mrf.mxu1 }
 0x11f   :  { %v160_v62 = vadd.f32 %v279_v50, %v159_v49 }
 0x121   :  { %v177_v1 = vmax.f32 %v160_v62, 0.0 }
 0x126   :  { %v162_v59 = vpop.f32.mrf.mxu1 }
 0x127   :  { %v163_v60 = vadd.f32 %v279_v50, %v162_v59 }
 0x129   :  { %v178_v63 = vmax.f32 %v163_v60, 0.0 }
 0x134   :  { %v165_v46 = vpop.f32.mrf.mxu3 }
 0x135   :  { %v166_v57 = vadd.f32 %v279_v50, %v165_v46 }
 0x137   :  { %v179_v61 = vmax.f32 %v166_v57, 0.0 }
 0x13c   :  { %v168_v48 = vpop.f32.mrf.mxu3 }
 0x13d   :  { %v169_v53 = vadd.f32 %v279_v50, %v168_v48 }
 0x13f   :  { %v180_v58 = vmax.f32 %v169_v53, 0.0 }
 0x144   :  { %v171_v51 = vpop.f32.mrf.mxu3 }
 0x145   :  { %v172_v52 = vadd.f32 %v279_v50, %v171_v51 }
 0x147   :  { %v181_v54 = vmax.f32 %v172_v52, 0.0 }
 0x149   :  { %259 = vmatpush.xpose.msk.msra.mxu2 %vm189_vm2, %v181_v54 }
 0x14d   :  { %260 = vmatpush.xpose.msk.msra.mxu2 %vm189_vm2, %v180_v58 }
 0x151   :  { %261 = vmatpush.xpose.msk.msra.mxu2 %vm189_vm2, %v179_v61 }
 0x155   :  { %262 = vmatpush.xpose.msk.msra.mxu2 %vm189_vm2, %v178_v63 }
 0x159   :  { %263 = vmatpush.xpose.msk.msra.mxu2 %vm189_vm2, %v177_v1 }
 0x15d   :  { %264 = vmatpush.xpose.msk.msra.mxu2 %vm189_vm2, %v176_v3 }
 0x161   :  { %265 = vmatpush.xpose.msk.msra.mxu2 %vm189_vm2, %v175_v5 }
 0x165   :  { %266 = vmatpush.xpose.msk.msra.mxu2 %vm189_vm2, %v174_v6 }
 0x168   :  { %267 = vmatmul.msk.f32.vlgmr.msra.gmra.mxu2 %vm189_vm2, %v182_v7 }
 0x1eb   :  { %v234_v9 = vpop.f32.mrf.mxu2 }
 0x1ec   :  { %v235_v10 = vadd.f32 %v234_v9, %v187_v8 }
 0x1ee   :  { %238 = vst.msk [vmem:[%s395_s2] sm:$0x1] %vm237_vm3, %v235_v10 }

</bundles_post_ra>
